<compile_context>
chip_gen: v7x
topology: tpu7x:2x2x1
jax: 0.10.0
libtpu: 0.0.40
codegen_flags: <defaults>
</compile_context>

<pallas_src>
import jax
import jax.numpy as jnp
from jax.experimental import pallas as pl
from jax.experimental.pallas import tpu as pltpu


# ---------------------------------------------------------------------------
# Kernel 1: fused Q/K/V projection (x @ W + b), tiled over (batch, seq tile).
# ---------------------------------------------------------------------------
def _qkv_proj_kernel(x_ref, wq_ref, bq_ref, wk_ref, bk_ref, wv_ref, bv_ref,
                     q_ref, k_ref, v_ref):
    x = x_ref[0]                                                  # (TS, D)
    q = jnp.dot(x, wq_ref[...], preferred_element_type=jnp.float32) + bq_ref[0]
    k = jnp.dot(x, wk_ref[...], preferred_element_type=jnp.float32) + bk_ref[0]
    v = jnp.dot(x, wv_ref[...], preferred_element_type=jnp.float32) + bv_ref[0]
    q_ref[0] = q.astype(q_ref.dtype)
    k_ref[0] = k.astype(k_ref.dtype)
    v_ref[0] = v.astype(v_ref.dtype)


# ---------------------------------------------------------------------------
# Kernel 2: flash attention with online softmax over KV tiles.
# grid = (B, N//TQ, N//TK); KV axis last + "arbitrary"; m/l/acc in VMEM scratch.
# ---------------------------------------------------------------------------
def _flash_attn_kernel(q_ref, k_ref, v_ref, o_ref, m_sc, l_sc, acc_sc):
    ki = pl.program_id(2)

    @pl.when(ki == 0)
    def _():
        m_sc[...] = jnp.full_like(m_sc, -jnp.inf)
        l_sc[...] = jnp.zeros_like(l_sc)
        acc_sc[...] = jnp.zeros_like(acc_sc)

    q = q_ref[0]                       # (TQ, DK) -- 1/sqrt(dk) already folded in
    k = k_ref[0]                       # (TK, DK)
    v = v_ref[0]                       # (TK, DV)

    # scores = q @ k^T, contracting the last dims directly (no XLU transpose).
    s = jax.lax.dot_general(
        q, k, dimension_numbers=(((1,), (1,)), ((), ())),
        preferred_element_type=jnp.float32)                       # (TQ, TK)

    m_prev = m_sc[...]
    m_new = jnp.maximum(m_prev, jnp.max(s, axis=-1, keepdims=True))
    alpha = jnp.exp(m_prev - m_new)
    p = jnp.exp(s - m_new)

    l_sc[...] = alpha * l_sc[...] + jnp.sum(p, axis=-1, keepdims=True)
    acc_sc[...] = alpha * acc_sc[...] + jnp.dot(
        p.astype(v.dtype), v, preferred_element_type=jnp.float32)
    m_sc[...] = m_new

    @pl.when(ki == pl.num_programs(2) - 1)
    def _():
        inv_l = pl.reciprocal(l_sc[...], approx=True)
        o_ref[0] = (acc_sc[...] * inv_l).astype(o_ref.dtype)


# ---------------------------------------------------------------------------
# Wrapper
# ---------------------------------------------------------------------------
def self_attention(x, wq, bq, wk, bk, wv, bv, *, seq_tile=128, kv_tile=128):
    B, N, D = x.shape
    DK = wq.shape[1]
    DV = wv.shape[1]
    scale = float(DK) ** -0.5

    ts = min(seq_tile, N)      # projection sequence tile
    tq = min(seq_tile, N)      # query tile
    tk = min(kv_tile, N)       # kv tile
    assert N % ts == 0 and N % tq == 0 and N % tk == 0, \
        "sequence length must divide the tile sizes"

    # Fold the 1/sqrt(dk) scale into the Q projection (host side, one-time).
    wq_s = (wq * scale).astype(wq.dtype)
    bq_s = (bq * scale).astype(bq.dtype)

    # 2-D biases for TPU-friendly layout.
    bq2 = bq_s.reshape(1, DK)
    bk2 = bk.reshape(1, DK)
    bv2 = bv.reshape(1, DV)

    vmem_limit = 48 * 1024 * 1024   # safe under v7x scoped limit; above default

    # ---- Q/K/V projection (computed once per token, not per attention tile) --
    # TODO(synk): for very large hidden sizes, also tile Wq/Wk/Wv over the D
    # (contraction) axis instead of keeping full weights resident.
    q, k, v = pl.pallas_call(
        _qkv_proj_kernel,
        out_shape=(
            jax.ShapeDtypeStruct((B, N, DK), x.dtype),
            jax.ShapeDtypeStruct((B, N, DK), x.dtype),
            jax.ShapeDtypeStruct((B, N, DV), x.dtype),
        ),
        grid_spec=pltpu.PrefetchScalarGridSpec(
            num_scalar_prefetch=0,
            grid=(B, N // ts),
            in_specs=[
                pl.BlockSpec((1, ts, D), lambda b, s: (b, s, 0)),   # x tile
                pl.BlockSpec((D, DK), lambda b, s: (0, 0)),         # Wq (scaled)
                pl.BlockSpec((1, DK), lambda b, s: (0, 0)),         # bq (scaled)
                pl.BlockSpec((D, DK), lambda b, s: (0, 0)),         # Wk
                pl.BlockSpec((1, DK), lambda b, s: (0, 0)),         # bk
                pl.BlockSpec((D, DV), lambda b, s: (0, 0)),         # Wv
                pl.BlockSpec((1, DV), lambda b, s: (0, 0)),         # bv
            ],
            out_specs=(
                pl.BlockSpec((1, ts, DK), lambda b, s: (b, s, 0)),
                pl.BlockSpec((1, ts, DK), lambda b, s: (b, s, 0)),
                pl.BlockSpec((1, ts, DV), lambda b, s: (b, s, 0)),
            ),
        ),
        compiler_params=pltpu.CompilerParams(
            dimension_semantics=("parallel", "parallel"),
            vmem_limit_bytes=vmem_limit),
    )(x, wq_s, bq2, wk, bk2, wv, bv2)

    # ---- flash attention ----------------------------------------------------
    out = pl.pallas_call(
        _flash_attn_kernel,
        out_shape=jax.ShapeDtypeStruct((B, N, DV), x.dtype),
        grid_spec=pltpu.PrefetchScalarGridSpec(
            num_scalar_prefetch=0,
            grid=(B, N // tq, N // tk),
            in_specs=[
                pl.BlockSpec((1, tq, DK), lambda b, qi, ki: (b, qi, 0)),  # Q
                pl.BlockSpec((1, tk, DK), lambda b, qi, ki: (b, ki, 0)),  # K
                pl.BlockSpec((1, tk, DV), lambda b, qi, ki: (b, ki, 0)),  # V
            ],
            out_specs=pl.BlockSpec((1, tq, DV), lambda b, qi, ki: (b, qi, 0)),
            scratch_shapes=[
                pltpu.VMEM((tq, 1), jnp.float32),    # running max  m
                pltpu.VMEM((tq, 1), jnp.float32),    # running sum  l
                pltpu.VMEM((tq, DV), jnp.float32),   # accumulator
            ],
        ),
        compiler_params=pltpu.CompilerParams(
            dimension_semantics=("parallel", "parallel", "arbitrary"),
            vmem_limit_bytes=vmem_limit),
    )(q, k, v)
    return out


# ---------------------------------------------------------------------------
# Pure-JAX reference (matches the PyTorch module forward).
# ---------------------------------------------------------------------------
def _reference(x, wq, bq, wk, bk, wv, bv):
    q = x @ wq + bq
    k = x @ wk + bk
    v = x @ wv + bv
    dk = wq.shape[1]
    attn = (q @ jnp.swapaxes(k, -2, -1)) * (dk ** -0.5)
    attn = jax.nn.softmax(attn, axis=-1)
    return attn @ v


if __name__ == "__main__":
    # Lane-dense shapes (dk = dv = 128) so vregs / MXU passes are not padded.
    B, N, DIM, DK, DV = 2, 256, 128, 128, 128

    key = jax.random.PRNGKey(0)
    kx, kwq, kbq, kwk, kbk, kwv, kbv = jax.random.split(key, 7)

    x = jax.random.normal(kx, (B, N, DIM), dtype=jnp.float32)

    # Deterministic parameter init (mimicking nn.Linear uniform bounds).
    bound = DIM ** -0.5
    wq = jax.random.uniform(kwq, (DIM, DK), minval=-bound, maxval=bound, dtype=jnp.float32)
    bq = jax.random.uniform(kbq, (DK,),     minval=-bound, maxval=bound, dtype=jnp.float32)
    wk = jax.random.uniform(kwk, (DIM, DK), minval=-bound, maxval=bound, dtype=jnp.float32)
    bk = jax.random.uniform(kbk, (DK,),     minval=-bound, maxval=bound, dtype=jnp.float32)
    wv = jax.random.uniform(kwv, (DIM, DV), minval=-bound, maxval=bound, dtype=jnp.float32)
    bv = jax.random.uniform(kbv, (DV,),     minval=-bound, maxval=bound, dtype=jnp.float32)

    out = self_attention(x, wq, bq, wk, bk, wv, bv)
    out = jax.block_until_ready(out)

    ref = _reference(x, wq, bq, wk, bk, wv, bv)
    assert out.shape == (B, N, DV)
    # approx reciprocal + online softmax => slightly looser tolerance than 1e-5
    assert jnp.allclose(out, ref, atol=2e-3, rtol=2e-3), "mismatch vs reference"

    print("KERNEL_OK")
</pallas_src>

<mosaic_0001>
module attributes {stable_mosaic.version = 11 : i64} {
  func.func @_qkv_proj_kernel(%arg0: i32, %arg1: i32, %arg2: memref<1x128x128xf32, #tpu.memory_space<vmem>>, %arg3: memref<128x128xf32, #tpu.memory_space<vmem>>, %arg4: memref<1x128xf32, #tpu.memory_space<vmem>>, %arg5: memref<128x128xf32, #tpu.memory_space<vmem>>, %arg6: memref<1x128xf32, #tpu.memory_space<vmem>>, %arg7: memref<128x128xf32, #tpu.memory_space<vmem>>, %arg8: memref<1x128xf32, #tpu.memory_space<vmem>>, %arg9: memref<1x128x128xf32, #tpu.memory_space<vmem>>, %arg10: memref<1x128x128xf32, #tpu.memory_space<vmem>>, %arg11: memref<1x128x128xf32, #tpu.memory_space<vmem>>) attributes {dimension_semantics = [#tpu.dimension_semantics<parallel>, #tpu.dimension_semantics<parallel>], iteration_bounds = array<i64: 2, 2>, scalar_prefetch = 0 : i64, scratch_operands = 0 : i64, tpu.core_type = #tpu.core_type<tc>, window_params = [{transform_indices = @transform_0, window_bounds = array<i64: 1, 128, 128>}, {pipeline_mode = #tpu.pipeline_mode<synchronous>, transform_indices = @transform_1, window_bounds = array<i64: 128, 128>}, {pipeline_mode = #tpu.pipeline_mode<synchronous>, transform_indices = @transform_2, window_bounds = array<i64: 1, 128>}, {pipeline_mode = #tpu.pipeline_mode<synchronous>, transform_indices = @transform_3, window_bounds = array<i64: 128, 128>}, {pipeline_mode = #tpu.pipeline_mode<synchronous>, transform_indices = @transform_4, window_bounds = array<i64: 1, 128>}, {pipeline_mode = #tpu.pipeline_mode<synchronous>, transform_indices = @transform_5, window_bounds = array<i64: 128, 128>}, {pipeline_mode = #tpu.pipeline_mode<synchronous>, transform_indices = @transform_6, window_bounds = array<i64: 1, 128>}, {transform_indices = @transform_7, window_bounds = array<i64: 1, 128, 128>}, {transform_indices = @transform_8, window_bounds = array<i64: 1, 128, 128>}, {transform_indices = @transform_9, window_bounds = array<i64: 1, 128, 128>}]} {
    %c0 = arith.constant 0 : index
    %c0_0 = arith.constant 0 : index
    %c0_1 = arith.constant 0 : index
    %0 = vector.load %arg2[%c0, %c0_0, %c0_1] : memref<1x128x128xf32, #tpu.memory_space<vmem>>, vector<1x128x128xf32>
    %1 = vector.shape_cast %0 : vector<1x128x128xf32> to vector<128x128xf32>
    %c0_2 = arith.constant 0 : index
    %c0_3 = arith.constant 0 : index
    %2 = vector.load %arg3[%c0_2, %c0_3] : memref<128x128xf32, #tpu.memory_space<vmem>>, vector<128x128xf32>
    %cst = arith.constant dense<0.000000e+00> : vector<128x128xf32>
    %3 = tpu.matmul %1, %2, %cst {dimension_numbers = #tpu.dot_dimension_numbers<[1], [0], [0], [1], [0, 0, 1, 1], [], []>} : vector<128x128xf32>, vector<128x128xf32>, vector<128x128xf32> -> vector<128x128xf32>
    %c0_4 = arith.constant 0 : index
    %c0_5 = arith.constant 0 : index
    %4 = vector.load %arg4[%c0_4, %c0_5] : memref<1x128xf32, #tpu.memory_space<vmem>>, vector<1x128xf32>
    %5 = vector.shape_cast %4 : vector<1x128xf32> to vector<128xf32>
    %6 = vector.shape_cast %5 : vector<128xf32> to vector<1x128xf32>
    %7 = vector.broadcast %6 : vector<1x128xf32> to vector<128x128xf32>
    %8 = arith.addf %3, %7 : vector<128x128xf32>
    %c0_6 = arith.constant 0 : index
    %c0_7 = arith.constant 0 : index
    %9 = vector.load %arg5[%c0_6, %c0_7] : memref<128x128xf32, #tpu.memory_space<vmem>>, vector<128x128xf32>
    %cst_8 = arith.constant dense<0.000000e+00> : vector<128x128xf32>
    %10 = tpu.matmul %1, %9, %cst_8 {dimension_numbers = #tpu.dot_dimension_numbers<[1], [0], [0], [1], [0, 0, 1, 1], [], []>} : vector<128x128xf32>, vector<128x128xf32>, vector<128x128xf32> -> vector<128x128xf32>
    %c0_9 = arith.constant 0 : index
    %c0_10 = arith.constant 0 : index
    %11 = vector.load %arg6[%c0_9, %c0_10] : memref<1x128xf32, #tpu.memory_space<vmem>>, vector<1x128xf32>
    %12 = vector.shape_cast %11 : vector<1x128xf32> to vector<128xf32>
    %13 = vector.shape_cast %12 : vector<128xf32> to vector<1x128xf32>
    %14 = vector.broadcast %13 : vector<1x128xf32> to vector<128x128xf32>
    %15 = arith.addf %10, %14 : vector<128x128xf32>
    %c0_11 = arith.constant 0 : index
    %c0_12 = arith.constant 0 : index
    %16 = vector.load %arg7[%c0_11, %c0_12] : memref<128x128xf32, #tpu.memory_space<vmem>>, vector<128x128xf32>
    %cst_13 = arith.constant dense<0.000000e+00> : vector<128x128xf32>
    %17 = tpu.matmul %1, %16, %cst_13 {dimension_numbers = #tpu.dot_dimension_numbers<[1], [0], [0], [1], [0, 0, 1, 1], [], []>} : vector<128x128xf32>, vector<128x128xf32>, vector<128x128xf32> -> vector<128x128xf32>
    %c0_14 = arith.constant 0 : index
    %c0_15 = arith.constant 0 : index
    %18 = vector.load %arg8[%c0_14, %c0_15] : memref<1x128xf32, #tpu.memory_space<vmem>>, vector<1x128xf32>
    %19 = vector.shape_cast %18 : vector<1x128xf32> to vector<128xf32>
    %20 = vector.shape_cast %19 : vector<128xf32> to vector<1x128xf32>
    %21 = vector.broadcast %20 : vector<1x128xf32> to vector<128x128xf32>
    %22 = arith.addf %17, %21 : vector<128x128xf32>
    %c0_16 = arith.constant 0 : index
    %c0_17 = arith.constant 0 : index
    %c0_18 = arith.constant 0 : index
    %23 = vector.load %arg9[%c0_16, %c0_17, %c0_18] : memref<1x128x128xf32, #tpu.memory_space<vmem>>, vector<1x128x128xf32>
    %24 = vector.shape_cast %23 : vector<1x128x128xf32> to vector<128x128xf32>
    %25 = vector.shape_cast %8 : vector<128x128xf32> to vector<1x128x128xf32>
    tpu.vector_store %arg9[%c0_16, %c0_17, %c0_18], %25 {strides = array<i32>} : memref<1x128x128xf32, #tpu.memory_space<vmem>>, vector<1x128x128xf32>,
    %c0_19 = arith.constant 0 : index
    %c0_20 = arith.constant 0 : index
    %c0_21 = arith.constant 0 : index
    %26 = vector.load %arg10[%c0_19, %c0_20, %c0_21] : memref<1x128x128xf32, #tpu.memory_space<vmem>>, vector<1x128x128xf32>
    %27 = vector.shape_cast %26 : vector<1x128x128xf32> to vector<128x128xf32>
    %28 = vector.shape_cast %15 : vector<128x128xf32> to vector<1x128x128xf32>
    tpu.vector_store %arg10[%c0_19, %c0_20, %c0_21], %28 {strides = array<i32>} : memref<1x128x128xf32, #tpu.memory_space<vmem>>, vector<1x128x128xf32>,
    %c0_22 = arith.constant 0 : index
    %c0_23 = arith.constant 0 : index
    %c0_24 = arith.constant 0 : index
    %29 = vector.load %arg11[%c0_22, %c0_23, %c0_24] : memref<1x128x128xf32, #tpu.memory_space<vmem>>, vector<1x128x128xf32>
    %30 = vector.shape_cast %29 : vector<1x128x128xf32> to vector<128x128xf32>
    %31 = vector.shape_cast %22 : vector<128x128xf32> to vector<1x128x128xf32>
    tpu.vector_store %arg11[%c0_22, %c0_23, %c0_24], %31 {strides = array<i32>} : memref<1x128x128xf32, #tpu.memory_space<vmem>>, vector<1x128x128xf32>,
    return
  }
  func.func @transform_0(%arg0: i32, %arg1: i32) -> (i32, i32, i32) {
    %c0_i32 = arith.constant 0 : i32
    %c0_i32_0 = arith.constant 0 : i32
    return %arg0, %arg1, %c0_i32 : i32, i32, i32
  }
  func.func @transform_1(%arg0: i32, %arg1: i32) -> (i32, i32) {
    %c0_i32 = arith.constant 0 : i32
    %c0_i32_0 = arith.constant 0 : i32
    %c0_i32_1 = arith.constant 0 : i32
    return %c0_i32, %c0_i32_0 : i32, i32
  }
  func.func @transform_2(%arg0: i32, %arg1: i32) -> (i32, i32) {
    %c0_i32 = arith.constant 0 : i32
    %c0_i32_0 = arith.constant 0 : i32
    %c0_i32_1 = arith.constant 0 : i32
    return %c0_i32, %c0_i32_0 : i32, i32
  }
  func.func @transform_3(%arg0: i32, %arg1: i32) -> (i32, i32) {
    %c0_i32 = arith.constant 0 : i32
    %c0_i32_0 = arith.constant 0 : i32
    %c0_i32_1 = arith.constant 0 : i32
    return %c0_i32, %c0_i32_0 : i32, i32
  }
  func.func @transform_4(%arg0: i32, %arg1: i32) -> (i32, i32) {
    %c0_i32 = arith.constant 0 : i32
    %c0_i32_0 = arith.constant 0 : i32
    %c0_i32_1 = arith.constant 0 : i32
    return %c0_i32, %c0_i32_0 : i32, i32
  }
  func.func @transform_5(%arg0: i32, %arg1: i32) -> (i32, i32) {
    %c0_i32 = arith.constant 0 : i32
    %c0_i32_0 = arith.constant 0 : i32
    %c0_i32_1 = arith.constant 0 : i32
    return %c0_i32, %c0_i32_0 : i32, i32
  }
  func.func @transform_6(%arg0: i32, %arg1: i32) -> (i32, i32) {
    %c0_i32 = arith.constant 0 : i32
    %c0_i32_0 = arith.constant 0 : i32
    %c0_i32_1 = arith.constant 0 : i32
    return %c0_i32, %c0_i32_0 : i32, i32
  }
  func.func @transform_7(%arg0: i32, %arg1: i32) -> (i32, i32, i32) {
    %c0_i32 = arith.constant 0 : i32
    %c0_i32_0 = arith.constant 0 : i32
    return %arg0, %arg1, %c0_i32 : i32, i32, i32
  }
  func.func @transform_8(%arg0: i32, %arg1: i32) -> (i32, i32, i32) {
    %c0_i32 = arith.constant 0 : i32
    %c0_i32_0 = arith.constant 0 : i32
    return %arg0, %arg1, %c0_i32 : i32, i32, i32
  }
  func.func @transform_9(%arg0: i32, %arg1: i32) -> (i32, i32, i32) {
    %c0_i32 = arith.constant 0 : i32
    %c0_i32_0 = arith.constant 0 : i32
    return %arg0, %arg1, %c0_i32 : i32, i32, i32
  }
}

</mosaic_0001>

<bundles_post_ra>
// kernel: tpu_custom_call.1
= control target key start
LH: loop header
LB: loop body
LE: loop exit
PB: predicated region body
PF: predicated region fallthrough
CT: control target
= control target key end

     0   :  { %s2714_s0 = inlined_call_operand.hbm [shape: f32[2,256,128], index: 0, kind: input, shape index: {}]   ;;  %s2715_s1 = inlined_call_operand.hbm [shape: f32[128,128], index: 1, kind: input, shape index: {}]   ;;  %s2716_s2 = inlined_call_operand.vmem [shape: f32[1,128], index: 2, kind: input, shape index: {}]   ;;  %s2717_s3 = inlined_call_operand.hbm [shape: f32[128,128], index: 3, kind: input, shape index: {}]   ;;  %s2718_s4 = inlined_call_operand.vmem [shape: f32[1,128], index: 4, kind: input, shape index: {}]   ;;  %s2719_s5 = inlined_call_operand.hbm [shape: f32[128,128], index: 5, kind: input, shape index: {}]   ;;  %s2720_s6 = inlined_call_operand.vmem [shape: f32[1,128], index: 6, kind: input, shape index: {}]   ;;  %s2721_s7 = inlined_call_operand.hbm [shape: f32[2,256,128], index: 7, kind: output, shape index: {0}]   ;;  %s2722_s8 = inlined_call_operand.hbm [shape: f32[2,256,128], index: 8, kind: output, shape index: {1}]   ;;  %s2723_s9 = inlined_call_operand.hbm [shape: f32[2,256,128], index: 9, kind: output, shape index: {2}]  }
   0x1   :  { %2736 = sst [smem:[#allocation23_spill]] %s2715_s1 }
   0x2   :  { %2737 = sst [smem:[#allocation24_spill]] %s2717_s3 }
   0x3   :  { %2738 = sst [smem:[#allocation25_spill]] %s2719_s5 }
   0x4   :  { %2739 = sst [smem:[#allocation26_spill]] %s2720_s6 }
   0x5   :  { %2740 = sst [smem:[#allocation27_spill]] %s2721_s7 }
   0x6   :  { %2741 = sst [smem:[#allocation28_spill]] %s2722_s8 }
   0x7   :  { %2742 = sst [smem:[#allocation29_spill]] %s2723_s9 }
   0x8   :  { %15 = vsyncpa [#allocation3], 0 }
   0x9   :  { %17 = vsyncpa [#allocation3 + $0x1], 0 }
   0xa   :  { %18 = vsyncpa [#allocation6], 0 }
   0xb   :  { %19 = vsyncpa [#allocation9], 0 }
   0xc   :  { %20 = vsyncpa [#allocation4], 0 }
   0xd   :  { %22 = vsyncpa [#allocation4 + $0x1], 0 }
   0xe   :  { %23 = vsyncpa [#allocation12], 0 }
   0xf   :  { %25 = vsyncpa [#allocation12 + $0x1], 0  ;;  %s2133_s30 = smov 0   ;;  %s2135_s10 = smov 0  }
  0x10   :  { %s2137_s11 = smov 0   ;;  %s2139_s12 = smov 0  }
  0x11   :  { %s2141_s13 = smov 0   ;;  %s2143_s14 = smov 0  }
  0x12   :  { %s2145_s15 = smov 0   ;;  %s2147_s16 = smov 0  }
  0x13 LB: > { %2743 = sst [smem:[#allocation19_spill]] %s2042_s30  ;;  %s2174_s17 = sadd.s32 4294967295, %s2070_s16   ;;  %s2070_s16 = sphi %s2147_s16, %s31_s16   ;;  %s2066_s15 = sphi %s2145_s15, %s2783_s15   ;;  %s2062_s14 = sphi %s2143_s14, %s2782_s14   ;;  %s2058_s13 = sphi %s2141_s13, %s2781_s13   ;;  %s2054_s12 = sphi %s2139_s12, %s2780_s12   ;;  %s2050_s11 = sphi %s2137_s11, %s2779_s11   ;;  %s2046_s10 = sphi %s2135_s10, %s2778_s10   ;;  %s2042_s30 = sphi %s2133_s30, %s2777_s30  }
  0x14   : > { %2744 = sst [smem:[#allocation20_spill]] %s2058_s13  ;;  %s2724_s18 = sadd.s32 4294967294, %s2070_s16  }
  0x15   : > { %p65_p0 = scmp.ne.s32.totalorder %s2046_s10, %s2042_s30  ;;  %p2728_p1 = scmp.eq.s32.totalorder %s2174_s17, 0 }
  0x16   : > { %p223_p3 = scmp.eq.s32.totalorder %s2724_s18, 3  ;;  %p1257_p5 = scmp.ge.s32.totalorder %s2070_s16, 1 }
  0x17   : > { %p2185_p4 = por %p2728_p1, %p65_p0  ;;  %p286_p7 = scmp.lt.s32.totalorder %s2070_s16, 5 }
  0x18   : > { %p2190_p6 = por %p223_p3, %p65_p0  ;;  %s2072_s22 = smov [#allocation5]  }
  0x19   : > { %s2745_s19 = scalar_select %p2185_p4, 1, 0 }
  0x1a   : > { %s2746_s20 = scalar_select %p2190_p6, 1, 0 }
  0x1b   : > { %p2195_p8 = pnand %p1257_p5, %p286_p7  ;;  %s298_s23 = sshll.u32 %s2072_s22, 4  ;;  %s2199_s23 = int_to_ptr.vmem [resolvable:$true] %s298_s23 }
  0x1c   : > { %2747 = sst [smem:[#allocation21_spill]] %s2746_s20  ;;  %s2073_s25 = smov [#allocation7]  }
  0x1d   : > { %s2748_s21 = scalar_select %p2195_p8, 1, 0 }
  0x1e   : > { %p1687_p9 = pneg %p2195_p8  ;;  %s314_s26 = sshll.u32 %s2073_s25, 4  ;;  %s2209_s26 = int_to_ptr.vmem [resolvable:$true] %s314_s26 }
  0x1f   : > { %s2074_s27 = smov [#allocation8]   ;;  %s2750_s1 = sld [smem:[#allocation23_spill]] }
  0x20   : > { %p2205_p10 = pnand %p1687_p9, %p2728_p1  ;;  %s2211_s28 = sshll.u32 %s2074_s27, 4  ;;  %s331_s28 = int_to_ptr.vmem [resolvable:$true] %s2211_s28 }
  0x22   : > { %p2221_p12 = pneg %p2205_p10 }
  0x25   : > { %s1790_s22 = scalar_lea.hbm %s2750_s1, 2048 }
  0x26   : > { %p1791_p11 = scmp.ne.s32.totalorder %s2750_s1, %s1790_s22  ;;  %p1797_p3 = scmp.lt.u32.totalorder %s1790_s22, %s2750_s1 }
  0x28   : > { %p1793_p13 = pnand %p2221_p12, %p1791_p11 }
  0x2a   : > { %p1794_p0 = pneg %p1793_p13 }
  0x2c   : > { %p1799_p5 = pnand %p1797_p3, %p1794_p0 }
  0x2e   : > { %1802 = shalt.err (!%p1799_p5)
}
  0x2f   : > { %s1803_s30 = scalar_lea.vmem %s2199_s23, 2048  ;;  %p1811_p2 = scmp.lt.s32.totalorder %s2199_s23, %s2199_s23 }
  0x30   : > { %p1804_p7 = scmp.ne.s32.totalorder %s2199_s23, %s1803_s30  ;;  %p1812_p6 = scmp.lt.s32.totalorder %s1803_s30, %s1803_s30 }
  0x32   : > { %p1806_p9 = pnand %p1804_p7, %p2221_p12  ;;  %p1813_p11 = por %p1812_p6, %p1811_p2 }
  0x34   : > { %p1807_p1 = pneg %p1806_p9 }
  0x36   : > { %p1814_p13 = pnand %p1813_p11, %p1807_p1 }
  0x38   : > { %1817 = shalt.err (!%p1814_p13)
}
  0x39   : > { %s2733_s18 = smov 128   ;;  %s2734_s20 = smov 8  }
  0x3a   : > { %1690 = dma.hbm_to_vmem [thread:$0]  (!%p2205_p10), %s2750_s1, 2048, %s2199_s23, [#allocation6], %s2733_s18, %s2733_s18, %s2734_s20  }
  0x3b   : > { %s2752_s3 = sld [smem:[#allocation24_spill]] }
  0x41   : > { %s1818_s30 = scalar_lea.hbm %s2752_s3, 2048 }
  0x42   : > { %p1819_p1 = scmp.ne.s32.totalorder %s2752_s3, %s1818_s30  ;;  %p1825_p0 = scmp.lt.u32.totalorder %s1818_s30, %s2752_s3 }
  0x44   : > { %p1821_p2 = pnand %p1819_p1, %p2221_p12 }
  0x46   : > { %p1822_p6 = pneg %p1821_p2 }
  0x48   : > { %p1827_p3 = pnand %p1825_p0, %p1822_p6 }
  0x4a   : > { %1830 = shalt.err (!%p1827_p3)
}
  0x4b   : > { %s1831_s23 = scalar_lea.vmem %s2209_s26, 2048  ;;  %p1839_p11 = scmp.lt.s32.totalorder %s2209_s26, %s2209_s26 }
  0x4c   : > { %p1832_p5 = scmp.ne.s32.totalorder %s2209_s26, %s1831_s23  ;;  %p1840_p13 = scmp.lt.s32.totalorder %s1831_s23, %s1831_s23 }
  0x4e   : > { %p1834_p7 = pnand %p1832_p5, %p2221_p12  ;;  %p1841_p1 = por %p1840_p13, %p1839_p11 }
  0x50   : > { %p1835_p9 = pneg %p1834_p7 }
  0x52   : > { %p1842_p2 = pnand %p1841_p1, %p1835_p9 }
  0x54   : > { %1845 = shalt.err (!%p1842_p2)
}
  0x55   : > { %1693 = dma.hbm_to_vmem [thread:$0]  (!%p2205_p10), %s2752_s3, 2048, %s2209_s26, [#allocation6], %s2733_s18, %s2733_s18, %s2734_s20  }
  0x56   : > { %s2753_s5 = sld [smem:[#allocation25_spill]] }
  0x5c   : > { %s1846_s29 = scalar_lea.hbm %s2753_s5, 2048 }
  0x5d   : > { %p1847_p6 = scmp.ne.s32.totalorder %s2753_s5, %s1846_s29  ;;  %p1853_p5 = scmp.lt.u32.totalorder %s1846_s29, %s2753_s5 }
  0x5f   : > { %p1849_p0 = pnand %p1847_p6, %p2221_p12 }
  0x61   : > { %p1850_p3 = pneg %p1849_p0 }
  0x63   : > { %p1855_p7 = pnand %p1853_p5, %p1850_p3 }
  0x65   : > { %1858 = shalt.err (!%p1855_p7)
}
  0x66   : > { %s1859_s23 = scalar_lea.vmem %s331_s28, 2048  ;;  %p1867_p1 = scmp.lt.s32.totalorder %s331_s28, %s331_s28 }
  0x67   : > { %p1860_p9 = scmp.ne.s32.totalorder %s331_s28, %s1859_s23  ;;  %p1868_p2 = scmp.lt.s32.totalorder %s1859_s23, %s1859_s23 }
  0x69   : > { %p1862_p11 = pnand %p1860_p9, %p2221_p12  ;;  %p1869_p4 = por %p1868_p2, %p1867_p1 }
  0x6b   : > { %p1863_p13 = pneg %p1862_p11 }
  0x6d   : > { %p1870_p8 = pnand %p1869_p4, %p1863_p13 }
  0x6f   : > { %1873 = shalt.err (!%p1870_p8)
}
  0x70   : > { %1696 = dma.hbm_to_vmem [thread:$0]  (!%p2205_p10), %s2753_s5, 2048, %s331_s28, [#allocation9], %s2733_s18, %s2733_s18, %s2734_s20  }
  0x71   : > { %s40_s9 = sadd.s32 1, %s2062_s14  ;;  %s43_s24 = sadd.s32 1, %s2066_s15 }
  0x72   : > { %p41_p4 = scmp.ge.s32.totalorder %s40_s9, 2  ;;  %s52_s7 = sadd.s32 1, %s2050_s11 }
  0x73   : > { %p59_p8 = scmp.ne.s32.totalorder %s2050_s11, %s2046_s10  ;;  %p60_p12 = scmp.eq.s32.totalorder %s2070_s16, 0 }
  0x74   : > { %s2785_s9 = smov (%p41_p4, %s40_s9), 0  ;;  %s2787_s24 = smov (!%p41_p4, %s43_s24), %s2066_s15 }
  0x75   : > { %s48_s8 = ssub.s32 %s2062_s14, %s2785_s9  ;;  %p45_p6 = scmp.ge.s32.totalorder %s2787_s24, 2 }
  0x76   : > { %p2754_p0 = scmp.eq.s32.totalorder %s2174_s17, 3  ;;  %p2310_p10 = por %p60_p12, %p59_p8 }
  0x77   : > { %p1714_p5 = scmp.lt.s32.totalorder %s2070_s16, 4  ;;  %s2789_s24 = smov (%p45_p6, %s2787_s24), 0 }
  0x78   : > { %p2306_p3 = por %p2754_p0, %p59_p8  ;;  %2757 = sst [smem:[#allocation22_spill]] %s2789_s24 }
  0x79   : > { %s347_s29 = sand.u32 1, %s2050_s11   ;;  %s1263_s22 = sshll.u32 %s2062_s14, 4 }
  0x7a   : > { %s47_s25 = ssub.s32 %s2066_s15, %s2789_s24  ;;  %s1262_s30 = sshll.u32 %s347_s29, 7 }
  0x7b   : > { %s49_s27 = sor.u32 %s48_s8, %s47_s25  ;;  %s1264_s23 = sshll.u32 %s2066_s15, 5 }
  0x7c   : > { %p50_p7 = scmp.eq.s32.totalorder %s49_s27, 0  ;;  %s351_s26 = scalar_lea.vmem [#allocation2], %s1262_s30 }
  0x7d   : > { %s360_s6 = sshll.u32 %s351_s26, 4  ;;  %s357_s20 = sadd.s32 %s1264_s23, %s1263_s22  ;;  %s2325_s6 = int_to_ptr.vmem [resolvable:$true] %s360_s6 }
  0x7e   : > { %s2323_s18 = scalar_select %p50_p7, %s2050_s11, %s52_s7  }
  0x7f   : > { %s1265_s1 = sshll.u32 %s357_s20, 7  ;;  %p2331_p9 = pnand %p1714_p5, %p2310_p10 }
  0x80   : > { %s2338_s8 = scalar_lea.hbm %s2714_s0, %s1265_s1  ;;  %s2340_s7 = scalar_lea.sflag [#allocation3], %s347_s29 }
  0x81   : > { %s1874_s20 = scalar_lea.hbm %s2338_s8, 2048  ;;  %p1876_p13 = pneg %p2331_p9 }
  0x82   : > { %p1875_p11 = scmp.ne.s32.totalorder %s2338_s8, %s1874_s20  ;;  %s1879_s24 = scalar_lea.hbm %s2714_s0, 8192 }
  0x83   : > { %p1880_p4 = scmp.lt.u32.totalorder %s2338_s8, %s2714_s0  ;;  %p1881_p8 = scmp.lt.u32.totalorder %s1879_s24, %s1874_s20 }
  0x84   : > { %p1877_p1 = pnand %p1876_p13, %p1875_p11  ;;  %p1883_p6 = scmp.lt.u32.totalorder %s1874_s20, %s2338_s8 }
  0x85   : > { %p1882_p12 = por %p1881_p8, %p1880_p4 }
  0x86   : > { %p1878_p2 = pneg %p1877_p1 }
  0x87   : > { %p1884_p0 = por %p1883_p6, %p1882_p12 }
  0x89   : > { %p1885_p10 = pnand %p1884_p0, %p1878_p2 }
  0x8b   : > { %1888 = shalt.err (!%p1885_p10)
}
  0x8c   : > { %s1889_s29 = scalar_lea.vmem %s2325_s6, 2048  ;;  %s2077_s25 = smov [#allocation2]  }
  0x8d   : > { %p1890_p5 = scmp.ne.s32.totalorder %s2325_s6, %s1889_s29  ;;  %s1894_s27 = sshll.u32 %s2077_s25, 4  ;;  %s1895_s27 = int_to_ptr.vmem [resolvable:$false] %s1894_s27 }
  0x8e   : > { %s1896_s30 = scalar_lea.vmem %s1895_s27, 4096  ;;  %p1897_p1 = scmp.lt.s32.totalorder %s2325_s6, %s1895_s27 }
  0x8f   : > { %p1892_p7 = pnand %p1890_p5, %p1876_p13  ;;  %p1898_p4 = scmp.lt.s32.totalorder %s1896_s30, %s1889_s29 }
  0x91   : > { %p1893_p11 = pneg %p1892_p7  ;;  %p1899_p8 = por %p1898_p4, %p1897_p1 }
  0x93   : > { %p1900_p12 = pnand %p1899_p8, %p1893_p11 }
  0x95   : > { %1903 = shalt.err (!%p1900_p12)
}
  0x96   : > { %s2759_s23 = smov 8   ;;  %s2760_s26 = smov 128  }
  0x97   : > { %1700 = dma.hbm_to_vmem [thread:$0]  (!%p2331_p9), %s2338_s8, 2048, %s2325_s6, %s2340_s7, %s2760_s26, %s2760_s26, %s2759_s23  }
  0x98   : > { %p2761_p13 = scmp.ne.s32.totalorder %s2748_s21, 0 }
  0x99   : > { %s2374_s20 = sand.u32 (!%p2761_p13), 1, %s2046_s10   ;;  %p2762_p2 = scmp.ne.s32.totalorder (!%p2761_p13), %s2745_s19, 0 }
  0x9a   : > { %372 = sbr.rel (%p2761_p13) target bundleno = 510 (0x1fe), region = 48  ;;  %s2377_s28 = sshll.u32 (!%p2761_p13), %s2374_s20, 7 }
  0x9b   : > { %s375_s3 = scalar_lea.sflag (!%p2761_p13), [#allocation3], %s2374_s20  ;;  %s2381_s5 = scalar_lea.vmem (!%p2761_p13), [#allocation2], %s2377_s28 }
  0xa1   : > { %2021 = dma.done.wait (%p2762_p2), %s375_s3, 2048  }
  0xa2   : > { %2023 = vsyncadd (%p2762_p2), %s375_s3, 4294965248  ;;  %p2763_p9 = scmp.eq.s32.totalorder %s2174_s17, 0 }
  0xa4   : > { %2025 = dma.done.wait (%p2763_p9), [#allocation6], 4096   ;;  %p2764_p6 = pmov %p2763_p9 }
  0xa6   : > { %2027 = vsyncadd (%p2764_p6), [#allocation6], 4294963200  ;;  %p2765_p0 = pmov %p2764_p6 }
  0xa8   : > { %2029 = dma.done.wait (%p2765_p0), [#allocation9], 2048   ;;  %p2766_p10 = pmov %p2765_p0 }
  0xa9   : > { %v455_v0 = vld [vmem:[#allocation5] sm:$0xff]  ;;  %v456_v1 = vld [vmem:[#allocation5 + $0x8] sm:$0xff]  ;;  %v457_v5 = vld [vmem:[#allocation5 + $0x10] sm:$0xff]  ;;  %s2465_s7 = scalar_lea.vmem [#allocation10], %s2377_s28  ;;  %s2470_s24 = scalar_lea.vmem [#allocation11], %s2377_s28 }
  0xaa   : > { %2031 = vsyncadd (%p2766_p10), [#allocation9], 4294965248  ;;  %v623_v2 = vld [vmem:[#allocation7] sm:$0xff]  ;;  %v1555_v3 = vpack.c.bf16 %v456_v1, %v455_v0  ;;  %v624_v4 = vld [vmem:[#allocation7 + $0x8] sm:$0xff]  ;;  %s2767_s1 = sld [smem:[#allocation20_spill]]  ;;  %s1280_s22 = sshll.u32 %s2054_s12, 4 }
  0xab   : > { %v458_v6 = vld [vmem:[#allocation5 + $0x18] sm:$0xff]  ;;  %v1587_v7 = vpack.c.bf16 %v624_v4, %v623_v2  ;;  %v625_v9 = vld [vmem:[#allocation7 + $0x10] sm:$0xff]  ;;  %v459_v11 = vld [vmem:[#allocation5 + $0x20] sm:$0xff]  ;;  %s1012_s12 = sand.u32 1, %s2174_s17   ;;  %s1033_s30 = sshll.u32 %s2465_s7, 4  ;;  %s2544_s30 = int_to_ptr.vmem [resolvable:$true] %s1033_s30 }
  0xac   : > { %v1559_v8 = vpack.c.bf16 %v458_v6, %v457_v5  ;;  %v626_v10 = vld [vmem:[#allocation7 + $0x18] sm:$0xff]  ;;  %1556 = vmatprep.subr.bf16.mxu0 %v1555_v3  ;;  %v460_v13 = vld [vmem:[#allocation5 + $0x28] sm:$0xff]  ;;  %v627_v14 = vld [vmem:[#allocation7 + $0x20] sm:$0xff]  ;;  %s1051_s23 = sshll.u32 %s2470_s24, 4  ;;  %s2769_s6 = sld [smem:[#allocation27_spill]]  ;;  %s2554_s23 = int_to_ptr.vmem [resolvable:$true] %s1051_s23 }
  0xad   : > { %v1591_v12 = vpack.c.bf16 %v626_v10, %v625_v9  ;;  %v628_v15 = vld [vmem:[#allocation7 + $0x28] sm:$0xff]  ;;  %1588 = vmatprep.subr.bf16.mxu1 %v1587_v7  ;;  %1558 = vmatpush3.bf16.msra.mxu0 %v1555_v3  ;;  %v1563_v16 = vpack.c.bf16 %v460_v13, %v459_v11  ;;  %v461_v18 = vld [vmem:[#allocation5 + $0x30] sm:$0xff]  ;;  %v462_v19 = vld [vmem:[#allocation5 + $0x38] sm:$0xff]  ;;  %s1008_s26 = scalar_lea.sflag [#allocation4], %s2374_s20  ;;  %s1904_s3 = scalar_lea.vmem %s2544_s30, 2048 }
  0xae   : > { %1590 = vmatpush3.bf16.msra.mxu1 %v1587_v7  ;;  %1560 = vmatprep.subr.bf16.mxu0 %v1559_v8  ;;  %v1595_v17 = vpack.c.bf16 %v628_v15, %v627_v14  ;;  %v629_v20 = vld [vmem:[#allocation7 + $0x30] sm:$0xff]  ;;  %v630_v21 = vld [vmem:[#allocation7 + $0x38] sm:$0xff]  ;;  %v1567_v22 = vpack.c.bf16 %v462_v19, %v461_v18  ;;  %v463_v24 = vld [vmem:[#allocation5 + $0x40] sm:$0xff]  ;;  %p1905_p5 = scmp.ne.s32.totalorder %s2544_s30, %s1904_s3 }
  0xaf   : > { %1592 = vmatprep.subr.bf16.mxu1 %v1591_v12  ;;  %v1599_v23 = vpack.c.bf16 %v630_v21, %v629_v20  ;;  %v464_v25 = vld [vmem:[#allocation5 + $0x48] sm:$0xff]  ;;  %v2396_v26 = vld [vmem:[%s2381_s5] sm:$0xff]  ;;  %v465_v31 = vld [vmem:[#allocation5 + $0x50] sm:$0xff] }
  0xb0   : > { %v631_v27 = vld [vmem:[#allocation7 + $0x40] sm:$0xff]  ;;  %v632_v28 = vld [vmem:[#allocation7 + $0x48] sm:$0xff]  ;;  %1419 = vmatprep.mubr.f32.mxu0 %v2396_v26  ;;  %1475 = vmatprep.mubr.f32.mxu1 %v2396_v26  ;;  %v1571_v29 = vpack.c.bf16 %v464_v25, %v463_v24  ;;  %v466_v32 = vld [vmem:[#allocation5 + $0x58] sm:$0xff]  ;;  %s1281_s29 = sshll.u32 %s2767_s1, 5  ;;  %p1906_p7 = pnand %p1905_p5, %p2306_p3 }
  0xb1   : > { %1562 = vmatpush3.bf16.msra.mxu0 %v1559_v8  ;;  %v1603_v30 = vpack.c.bf16 %v632_v28, %v631_v27  ;;  %v633_v33 = vld [vmem:[#allocation7 + $0x50] sm:$0xff]  ;;  %v634_v34 = vld [vmem:[#allocation7 + $0x58] sm:$0xff]  ;;  %v1575_v35 = vpack.c.bf16 %v466_v32, %v465_v31  ;;  %v467_v37 = vld [vmem:[#allocation5 + $0x60] sm:$0xff]  ;;  %s1030_s25 = sadd.s32 %s1281_s29, %s1280_s22  ;;  %s2770_s29 = sld [smem:[#allocation28_spill]] }
  0xb2   : > { %1594 = vmatpush3.bf16.msra.mxu1 %v1591_v12  ;;  %1564 = vmatprep.subr.bf16.mxu0 %v1563_v16  ;;  %v1607_v36 = vpack.c.bf16 %v634_v34, %v633_v33  ;;  %v468_v38 = vld [vmem:[#allocation5 + $0x68] sm:$0xff]  ;;  %v635_v39 = vld [vmem:[#allocation7 + $0x60] sm:$0xff]  ;;  %v469_v43 = vld [vmem:[#allocation5 + $0x70] sm:$0xff]  ;;  %s2521_s27 = sshll.u32 %s1030_s25, 7  ;;  %p1907_p11 = pneg %p1906_p7 }
  0xb3   : > { %1596 = vmatprep.subr.bf16.mxu1 %v1595_v17  ;;  %v636_v40 = vld [vmem:[#allocation7 + $0x68] sm:$0xff]  ;;  %v1579_v41 = vpack.c.bf16 %v468_v38, %v467_v37  ;;  %v470_v44 = vld [vmem:[#allocation5 + $0x78] sm:$0xff]  ;;  %v637_v45 = vld [vmem:[#allocation7 + $0x70] sm:$0xff]  ;;  %s2542_s8 = scalar_lea.hbm %s2769_s6, %s2521_s27 }
  0xb4   : > { %v1611_v42 = vpack.c.bf16 %v636_v40, %v635_v39  ;;  %v638_v46 = vld [vmem:[#allocation7 + $0x78] sm:$0xff]  ;;  %v1583_v47 = vpack.c.bf16 %v470_v44, %v469_v43  ;;  %v791_v49 = vld [vmem:[#allocation8] sm:$0xff]  ;;  %v792_v50 = vld [vmem:[#allocation8 + $0x8] sm:$0xff] }
  0xb5   : > { %1566 = vmatpush3.bf16.msra.mxu0 %v1563_v16  ;;  %v1615_v48 = vpack.c.bf16 %v638_v46, %v637_v45  ;;  %v1619_v51 = vpack.c.bf16 %v792_v50, %v791_v49  ;;  %v793_v52 = vld [vmem:[#allocation8 + $0x10] sm:$0xff]  ;;  %v794_v53 = vld [vmem:[#allocation8 + $0x18] sm:$0xff]  ;;  %v2401_v54 = vld [vmem:[%s2381_s5 + $0x8] sm:$0xff] }
  0xb6   : > { %1598 = vmatpush3.bf16.msra.mxu1 %v1595_v17  ;;  %1568 = vmatprep.subr.bf16.mxu0 %v1567_v22  ;;  %v2404_v55 = vld [vmem:[%s2381_s5 + $0x10] sm:$0xff]  ;;  %v1623_v56 = vpack.c.bf16 %v794_v53, %v793_v52  ;;  %v795_v57 = vld [vmem:[#allocation8 + $0x20] sm:$0xff]  ;;  %v796_v58 = vld [vmem:[#allocation8 + $0x28] sm:$0xff] }
  0xb7   : > { %1600 = vmatprep.subr.bf16.mxu1 %v1599_v23  ;;  %v2409_v59 = vld [vmem:[%s2381_s5 + $0x18] sm:$0xff]  ;;  %v2414_v60 = vld [vmem:[%s2381_s5 + $0x20] sm:$0xff]  ;;  %v1627_v61 = vpack.c.bf16 %v796_v58, %v795_v57  ;;  %v797_v62 = vld [vmem:[#allocation8 + $0x30] sm:$0xff]  ;;  %s2552_s25 = scalar_lea.hbm %s2770_s29, %s2521_s27 }
  0xb8   : > { %v798_v63 = vld [vmem:[#allocation8 + $0x38] sm:$0xff]  ;;  %v2419_v0 = vld [vmem:[%s2381_s5 + $0x28] sm:$0xff]  ;;  %v2424_v1 = vld [vmem:[%s2381_s5 + $0x30] sm:$0xff] }
  0xb9   : > { %1570 = vmatpush3.bf16.msra.mxu0 %v1567_v22  ;;  %v1631_v2 = vpack.c.bf16 %v798_v63, %v797_v62  ;;  %v799_v3 = vld [vmem:[#allocation8 + $0x40] sm:$0xff]  ;;  %v800_v4 = vld [vmem:[#allocation8 + $0x48] sm:$0xff]  ;;  %v2429_v5 = vld [vmem:[%s2381_s5 + $0x38] sm:$0xff] }
  0xba   : > { %1602 = vmatpush3.bf16.msra.mxu1 %v1599_v23  ;;  %1572 = vmatprep.subr.bf16.mxu0 %v1571_v29  ;;  %v447_v6 = vld [vmem:[%s2381_s5 + $0x40] sm:$0xff]  ;;  %v1635_v7 = vpack.c.bf16 %v800_v4, %v799_v3  ;;  %v801_v8 = vld [vmem:[#allocation8 + $0x50] sm:$0xff]  ;;  %v802_v9 = vld [vmem:[#allocation8 + $0x58] sm:$0xff] }
  0xbb   : > { %1604 = vmatprep.subr.bf16.mxu1 %v1603_v30  ;;  %v448_v10 = vld [vmem:[%s2381_s5 + $0x48] sm:$0xff]  ;;  %v449_v11 = vld [vmem:[%s2381_s5 + $0x50] sm:$0xff]  ;;  %v1639_v12 = vpack.c.bf16 %v802_v9, %v801_v8  ;;  %v803_v13 = vld [vmem:[#allocation8 + $0x60] sm:$0xff] }
  0xbc   : > { %v804_v14 = vld [vmem:[#allocation8 + $0x68] sm:$0xff]  ;;  %v450_v15 = vld [vmem:[%s2381_s5 + $0x58] sm:$0xff]  ;;  %v451_v16 = vld [vmem:[%s2381_s5 + $0x60] sm:$0xff] }
  0xbd   : > { %1574 = vmatpush3.bf16.msra.mxu0 %v1571_v29  ;;  %v1643_v17 = vpack.c.bf16 %v804_v14, %v803_v13  ;;  %v805_v18 = vld [vmem:[#allocation8 + $0x70] sm:$0xff]  ;;  %v806_v19 = vld [vmem:[#allocation8 + $0x78] sm:$0xff]  ;;  %v452_v20 = vld [vmem:[%s2381_s5 + $0x68] sm:$0xff] }
  0xbe   : > { %1606 = vmatpush3.bf16.msra.mxu1 %v1603_v30  ;;  %1576 = vmatprep.subr.bf16.mxu0 %v1575_v35  ;;  %v453_v21 = vld [vmem:[%s2381_s5 + $0x70] sm:$0xff]  ;;  %v1647_v22 = vpack.c.bf16 %v806_v19, %v805_v18  ;;  %v454_v23 = vld [vmem:[%s2381_s5 + $0x78] sm:$0xff]  ;;  %v2454_v24 = vld [vmem:[%s2716_s2] ss:$0 sm:$0xff]  ;;  %s2768_s5 = sld [smem:[#allocation26_spill]] }
  0xbf   : > { %1608 = vmatprep.subr.bf16.mxu1 %v1607_v36  ;;  %v2459_v25 = vld [vmem:[%s2718_s4] ss:$0 sm:$0xff] }
  0xc1   : > { %1578 = vmatpush3.bf16.msra.mxu0 %v1575_v35 }
  0xc2   : > { %1610 = vmatpush3.bf16.msra.mxu1 %v1607_v36  ;;  %1580 = vmatprep.subr.bf16.mxu0 %v1579_v41 }
  0xc3   : > { %1612 = vmatprep.subr.bf16.mxu1 %v1611_v42 }
  0xc5   : > { %1582 = vmatpush3.bf16.msra.mxu0 %v1579_v41 }
  0xc6   : > { %1614 = vmatpush3.bf16.msra.mxu1 %v1611_v42  ;;  %1584 = vmatprep.subr.bf16.mxu0 %v1583_v47 }
  0xc7   : > { %1616 = vmatprep.subr.bf16.mxu1 %v1615_v48 }
  0xc9   : > { %1586 = vmatpush3.bf16.msra.mxu0 %v1583_v47 }
  0xca   : > { %1618 = vmatpush3.bf16.msra.mxu1 %v1615_v48  ;;  %1620 = vmatprep.subr.bf16.mxu0 %v1619_v51 }
  0xcb   : > { %1651 = vmatprep.subr.bf16.mxu1 %v1619_v51 }
  0xcc   : > { %1420 = vmatmul.mubr.f32.vlgmr.msra.gmra.mrb[0].mxu0 %v2401_v54 }
  0xcd   : > { %1476 = vmatmul.mubr.f32.vlgmr.msra.gmra.mrb[0].mxu1 %v2401_v54  ;;  %1622 = vmatpush3.bf16.msra.mxu0 %v1619_v51 }
  0xce   : > { %1659 = vmatpush3.bf16.msra.mxu1 %v1619_v51  ;;  %1422 = vmatprep.mubr.f32.mxu0 %v2404_v55 }
  0xcf   : > { %1478 = vmatprep.mubr.f32.mxu1 %v2404_v55  ;;  %1624 = vmatprep.subr.bf16.mxu0 %v1623_v56 }
  0xd0   : > { %1423 = vmatmul.mubr.f32.gmra.mrb[2].mxu0 %v2409_v59  ;;  %1652 = vmatprep.subr.bf16.mxu1 %v1623_v56 }
  0xd1   : > { %1479 = vmatmul.mubr.f32.gmra.mrb[2].mxu1 %v2409_v59  ;;  %1626 = vmatpush3.bf16.msra.mxu0 %v1623_v56 }
  0xd2   : > { %1660 = vmatpush3.bf16.msra.mxu1 %v1623_v56  ;;  %1425 = vmatprep.mubr.f32.mxu0 %v2414_v60 }
  0xd3   : > { %1481 = vmatprep.mubr.f32.mxu1 %v2414_v60  ;;  %1628 = vmatprep.subr.bf16.mxu0 %v1627_v61 }
  0xd4   : > { %1426 = vmatmul.mubr.f32.gmra.mrb[4].mxu0 %v2419_v0  ;;  %1653 = vmatprep.subr.bf16.mxu1 %v1627_v61 }
  0xd5   : > { %1482 = vmatmul.mubr.f32.gmra.mrb[4].mxu1 %v2419_v0  ;;  %1630 = vmatpush3.bf16.msra.mxu0 %v1627_v61 }
  0xd6   : > { %1661 = vmatpush3.bf16.msra.mxu1 %v1627_v61  ;;  %1428 = vmatprep.mubr.f32.mxu0 %v2424_v1 }
  0xd7   : > { %1484 = vmatprep.mubr.f32.mxu1 %v2424_v1  ;;  %1632 = vmatprep.subr.bf16.mxu0 %v1631_v2 }
  0xd8   : > { %1429 = vmatmul.mubr.f32.gmra.mrb[6].mxu0 %v2429_v5  ;;  %1654 = vmatprep.subr.bf16.mxu1 %v1631_v2 }
  0xd9   : > { %1485 = vmatmul.mubr.f32.gmra.mrb[6].mxu1 %v2429_v5  ;;  %1634 = vmatpush3.bf16.msra.mxu0 %v1631_v2 }
  0xda   : > { %1662 = vmatpush3.bf16.msra.mxu1 %v1631_v2  ;;  %1431 = vmatprep.mubr.f32.mxu0 %v447_v6 }
  0xdb   : > { %1487 = vmatprep.mubr.f32.mxu1 %v447_v6  ;;  %1636 = vmatprep.subr.bf16.mxu0 %v1635_v7 }
  0xdc   : > { %1432 = vmatmul.mubr.f32.gmra.mrb[8].mxu0 %v448_v10  ;;  %1655 = vmatprep.subr.bf16.mxu1 %v1635_v7 }
  0xdd   : > { %1488 = vmatmul.mubr.f32.gmra.mrb[8].mxu1 %v448_v10  ;;  %1638 = vmatpush3.bf16.msra.mxu0 %v1635_v7 }
  0xde   : > { %1663 = vmatpush3.bf16.msra.mxu1 %v1635_v7  ;;  %1434 = vmatprep.mubr.f32.mxu0 %v449_v11 }
  0xdf   : > { %1490 = vmatprep.mubr.f32.mxu1 %v449_v11  ;;  %1640 = vmatprep.subr.bf16.mxu0 %v1639_v12 }
  0xe0   : > { %1435 = vmatmul.mubr.f32.gmra.mrb[10].mxu0 %v450_v15  ;;  %1656 = vmatprep.subr.bf16.mxu1 %v1639_v12 }
  0xe1   : > { %1491 = vmatmul.mubr.f32.gmra.mrb[10].mxu1 %v450_v15  ;;  %1642 = vmatpush3.bf16.msra.mxu0 %v1639_v12 }
  0xe2   : > { %1664 = vmatpush3.bf16.msra.mxu1 %v1639_v12  ;;  %1437 = vmatprep.mubr.f32.mxu0 %v451_v16 }
  0xe3   : > { %1493 = vmatprep.mubr.f32.mxu1 %v451_v16  ;;  %1644 = vmatprep.subr.bf16.mxu0 %v1643_v17 }
  0xe4   : > { %1438 = vmatmul.mubr.f32.gmra.mrb[12].mxu0 %v452_v20  ;;  %1657 = vmatprep.subr.bf16.mxu1 %v1643_v17 }
  0xe5   : > { %1494 = vmatmul.mubr.f32.gmra.mrb[12].mxu1 %v452_v20  ;;  %1646 = vmatpush3.bf16.msra.mxu0 %v1643_v17 }
  0xe6   : > { %1665 = vmatpush3.bf16.msra.mxu1 %v1643_v17  ;;  %1440 = vmatprep.mubr.f32.mxu0 %v453_v21 }
  0xe7   : > { %1496 = vmatprep.mubr.f32.mxu1 %v453_v21  ;;  %1648 = vmatprep.subr.bf16.mxu0 %v1647_v22 }
  0xe8   : > { %1441 = vmatmul.mubr.f32.gmra.mrb[14].mxu0 %v454_v23  ;;  %1658 = vmatprep.subr.bf16.mxu1 %v1647_v22 }
  0xe9   : > { %1497 = vmatmul.mubr.f32.gmra.mrb[14].mxu1 %v454_v23  ;;  %1650 = vmatpush3.bf16.msra.mxu0 %v1647_v22 }
  0xea   : > { %1666 = vmatpush3.bf16.msra.mxu1 %v1647_v22  ;;  %1531 = vmatprep.mubr.f32.mxu0 %v2396_v26 }
  0xeb   : > { %1543 = vmatprep.mubr.f32.mxu1 %v447_v6 }
  0xec   : > { %1532 = vmatmul.mubr.f32.vlgmr.msra.gmra.mrb[16].mxu0 %v2401_v54 }
  0xed   : > { %1544 = vmatmul.mubr.f32.vlgmr.msra.gmra.mrb[16].mxu1 %v448_v10  ;;  %1534 = vmatprep.mubr.f32.mxu0 %v2404_v55 }
  0xee   : > { %1546 = vmatprep.mubr.f32.mxu1 %v449_v11 }
  0xf0   : > { %1535 = vmatmul.mubr.f32.gmra.mrb[18].mxu0 %v2409_v59 }
  0xf1   : > { %1547 = vmatmul.mubr.f32.gmra.mrb[18].mxu1 %v450_v15  ;;  %1537 = vmatprep.mubr.f32.mxu0 %v2414_v60 }
  0xf2   : > { %1549 = vmatprep.mubr.f32.mxu1 %v451_v16 }
  0xf4   : > { %1538 = vmatmul.mubr.f32.gmra.mrb[20].mxu0 %v2419_v0 }
  0xf5   : > { %1550 = vmatmul.mubr.f32.gmra.mrb[20].mxu1 %v452_v20  ;;  %1540 = vmatprep.mubr.f32.mxu0 %v2424_v1 }
  0xf6   : > { %1552 = vmatprep.mubr.f32.mxu1 %v453_v21 }
  0xf8   : > { %1541 = vmatmul.mubr.f32.gmra.mrb[22].mxu0 %v2429_v5 }
  0xf9   : > { %1553 = vmatmul.mubr.f32.gmra.mrb[22].mxu1 %v454_v23 }
 0x19f   : > { %v1421_v26 = vpop.f32.mrb[0].mxu0 }
 0x1a0   : > { %v550_v27 = vadd.f32 %v1421_v26, %v2454_v24  ;;  %v1477_v28 = vpop.f32.mrb[0].mxu1  ;;  %v544_v29 = vpop.f32.mrb[1].mxu0 }
 0x1a1   : > { %v718_v30 = vadd.f32 %v1477_v28, %v2459_v25  ;;  %v545_v31 = vadd.f32 %v2454_v24, %v544_v29  ;;  %v712_v32 = vpop.f32.mrb[1].mxu1 }
 0x1a2   : > { %960 = vst [vmem:[%s2465_s7 + $0x8] sm:$0xff] %v550_v27  ;;  %v713_v33 = vadd.f32 %v2459_v25, %v712_v32  ;;  %v2536_v27 = vld [vmem:[%s2768_s5] ss:$0 sm:$0xff]  ;;  %s2078_s5 = smov [#allocation10]  }
 0x1a3   : > { %976 = vst [vmem:[%s2470_s24 + $0x8] sm:$0xff] %v718_v30  ;;  %959 = vst [vmem:[%s2465_s7] sm:$0xff] %v545_v31  ;;  %v1424_v34 = vpop.f32.mrb[2].mxu0  ;;  %s1908_s19 = sshll.u32 %s2078_s5, 4  ;;  %s1909_s19 = int_to_ptr.vmem [resolvable:$false] %s1908_s19 }
 0x1a4   : > { %975 = vst [vmem:[%s2470_s24] sm:$0xff] %v713_v33  ;;  %v560_v35 = vadd.f32 %v1424_v34, %v2454_v24  ;;  %v1480_v36 = vpop.f32.mrb[2].mxu1  ;;  %v554_v37 = vpop.f32.mrb[3].mxu0  ;;  %s1910_s21 = scalar_lea.vmem %s1909_s19, 4096  ;;  %p1911_p1 = scmp.lt.s32.totalorder %s2544_s30, %s1909_s19 }
 0x1a5   : > { %v728_v38 = vadd.f32 %v1480_v36, %v2459_v25  ;;  %v555_v39 = vadd.f32 %v2454_v24, %v554_v37  ;;  %v722_v40 = vpop.f32.mrb[3].mxu1  ;;  %p1912_p4 = scmp.lt.s32.totalorder %s1910_s21, %s1904_s3 }
 0x1a6   : > { %962 = vst [vmem:[%s2465_s7 + $0x18] sm:$0xff] %v560_v35  ;;  %v723_v41 = vadd.f32 %v2459_v25, %v722_v40 }
 0x1a7   : > { %978 = vst [vmem:[%s2470_s24 + $0x18] sm:$0xff] %v728_v38  ;;  %961 = vst [vmem:[%s2465_s7 + $0x10] sm:$0xff] %v555_v39  ;;  %v1427_v42 = vpop.f32.mrb[4].mxu0  ;;  %p1913_p8 = por %p1912_p4, %p1911_p1 }
 0x1a8   : > { %977 = vst [vmem:[%s2470_s24 + $0x10] sm:$0xff] %v723_v41  ;;  %v570_v43 = vadd.f32 %v1427_v42, %v2454_v24  ;;  %v1483_v44 = vpop.f32.mrb[4].mxu1  ;;  %v564_v45 = vpop.f32.mrb[5].mxu0 }
 0x1a9   : > { %v738_v46 = vadd.f32 %v1483_v44, %v2459_v25  ;;  %v565_v47 = vadd.f32 %v2454_v24, %v564_v45  ;;  %v732_v48 = vpop.f32.mrb[5].mxu1  ;;  %p1914_p12 = pnand %p1913_p8, %p1907_p11 }
 0x1aa   : > { %964 = vst [vmem:[%s2465_s7 + $0x28] sm:$0xff] %v570_v43  ;;  %v733_v49 = vadd.f32 %v2459_v25, %v732_v48 }
 0x1ab   : > { %980 = vst [vmem:[%s2470_s24 + $0x28] sm:$0xff] %v738_v46  ;;  %963 = vst [vmem:[%s2465_s7 + $0x20] sm:$0xff] %v565_v47  ;;  %v1430_v50 = vpop.f32.mrb[6].mxu0 }
 0x1ac   : > { %979 = vst [vmem:[%s2470_s24 + $0x20] sm:$0xff] %v733_v49  ;;  %v580_v51 = vadd.f32 %v1430_v50, %v2454_v24  ;;  %v1486_v52 = vpop.f32.mrb[6].mxu1  ;;  %v574_v53 = vpop.f32.mrb[7].mxu0 }
 0x1ad   : > { %v748_v54 = vadd.f32 %v1486_v52, %v2459_v25  ;;  %v575_v55 = vadd.f32 %v2454_v24, %v574_v53  ;;  %v742_v56 = vpop.f32.mrb[7].mxu1 }
 0x1ae   : > { %966 = vst [vmem:[%s2465_s7 + $0x38] sm:$0xff] %v580_v51  ;;  %v743_v57 = vadd.f32 %v2459_v25, %v742_v56 }
 0x1af   : > { %982 = vst [vmem:[%s2470_s24 + $0x38] sm:$0xff] %v748_v54  ;;  %965 = vst [vmem:[%s2465_s7 + $0x30] sm:$0xff] %v575_v55  ;;  %v1433_v58 = vpop.f32.mrb[8].mxu0 }
 0x1b0   : > { %981 = vst [vmem:[%s2470_s24 + $0x30] sm:$0xff] %v743_v57  ;;  %v590_v59 = vadd.f32 %v1433_v58, %v2454_v24  ;;  %v1489_v60 = vpop.f32.mrb[8].mxu1  ;;  %v584_v61 = vpop.f32.mrb[9].mxu0 }
 0x1b1   : > { %v758_v62 = vadd.f32 %v1489_v60, %v2459_v25  ;;  %v585_v63 = vadd.f32 %v2454_v24, %v584_v61  ;;  %v752_v0 = vpop.f32.mrb[9].mxu1 }
 0x1b2   : > { %968 = vst [vmem:[%s2465_s7 + $0x48] sm:$0xff] %v590_v59  ;;  %v753_v1 = vadd.f32 %v2459_v25, %v752_v0 }
 0x1b3   : > { %984 = vst [vmem:[%s2470_s24 + $0x48] sm:$0xff] %v758_v62  ;;  %967 = vst [vmem:[%s2465_s7 + $0x40] sm:$0xff] %v585_v63  ;;  %v1436_v2 = vpop.f32.mrb[10].mxu0 }
 0x1b4   : > { %983 = vst [vmem:[%s2470_s24 + $0x40] sm:$0xff] %v753_v1  ;;  %v600_v3 = vadd.f32 %v1436_v2, %v2454_v24  ;;  %v1492_v4 = vpop.f32.mrb[10].mxu1  ;;  %v594_v5 = vpop.f32.mrb[11].mxu0 }
 0x1b5   : > { %v768_v6 = vadd.f32 %v1492_v4, %v2459_v25  ;;  %v595_v7 = vadd.f32 %v2454_v24, %v594_v5  ;;  %v762_v8 = vpop.f32.mrb[11].mxu1 }
 0x1b6   : > { %970 = vst [vmem:[%s2465_s7 + $0x58] sm:$0xff] %v600_v3  ;;  %v763_v9 = vadd.f32 %v2459_v25, %v762_v8 }
 0x1b7   : > { %986 = vst [vmem:[%s2470_s24 + $0x58] sm:$0xff] %v768_v6  ;;  %969 = vst [vmem:[%s2465_s7 + $0x50] sm:$0xff] %v595_v7  ;;  %v1439_v10 = vpop.f32.mrb[12].mxu0 }
 0x1b8   : > { %985 = vst [vmem:[%s2470_s24 + $0x50] sm:$0xff] %v763_v9  ;;  %v610_v11 = vadd.f32 %v1439_v10, %v2454_v24  ;;  %v1495_v12 = vpop.f32.mrb[12].mxu1  ;;  %v604_v13 = vpop.f32.mrb[13].mxu0 }
 0x1b9   : > { %v778_v14 = vadd.f32 %v1495_v12, %v2459_v25  ;;  %v605_v15 = vadd.f32 %v2454_v24, %v604_v13  ;;  %v772_v16 = vpop.f32.mrb[13].mxu1 }
 0x1ba   : > { %972 = vst [vmem:[%s2465_s7 + $0x68] sm:$0xff] %v610_v11  ;;  %v773_v17 = vadd.f32 %v2459_v25, %v772_v16 }
 0x1bb   : > { %988 = vst [vmem:[%s2470_s24 + $0x68] sm:$0xff] %v778_v14  ;;  %971 = vst [vmem:[%s2465_s7 + $0x60] sm:$0xff] %v605_v15  ;;  %v1442_v18 = vpop.f32.mrb[14].mxu0 }
 0x1bc   : > { %987 = vst [vmem:[%s2470_s24 + $0x60] sm:$0xff] %v773_v17  ;;  %v620_v19 = vadd.f32 %v1442_v18, %v2454_v24  ;;  %v1498_v20 = vpop.f32.mrb[14].mxu1  ;;  %v614_v21 = vpop.f32.mrb[15].mxu0 }
 0x1bd   : > { %v788_v22 = vadd.f32 %v1498_v20, %v2459_v25  ;;  %v615_v23 = vadd.f32 %v2454_v24, %v614_v21  ;;  %v782_v26 = vpop.f32.mrb[15].mxu1 }
 0x1be   : > { %974 = vst [vmem:[%s2465_s7 + $0x78] sm:$0xff] %v620_v19  ;;  %v783_v24 = vadd.f32 %v2459_v25, %v782_v26 }
 0x1bf   : > { %990 = vst [vmem:[%s2470_s24 + $0x78] sm:$0xff] %v788_v22  ;;  %973 = vst [vmem:[%s2465_s7 + $0x70] sm:$0xff] %v615_v23  ;;  %v1533_v28 = vpop.f32.mrb[16].mxu0 }
 0x1c0   : > { %989 = vst [vmem:[%s2470_s24 + $0x70] sm:$0xff] %v783_v24  ;;  %v886_v29 = vadd.f32 %v1533_v28, %v2536_v27  ;;  %v1545_v30 = vpop.f32.mrb[16].mxu1  ;;  %v880_v31 = vpop.f32.mrb[17].mxu0 }
 0x1c1   : > { %1917 = shalt.err (!%p1914_p12)
}
 0x1c2   : > { %s1918_s7 = scalar_lea.hbm %s2542_s8, 2048  ;;  %s1922_s22 = scalar_lea.hbm %s2769_s6, 8192 }
 0x1c3   : > { %p1919_p13 = scmp.ne.s32.totalorder %s2542_s8, %s1918_s7  ;;  %p1923_p6 = scmp.lt.u32.totalorder %s2542_s8, %s2769_s6 }
 0x1c4   : > { %p1924_p0 = scmp.lt.u32.totalorder %s1922_s22, %s1918_s7  ;;  %p1926_p5 = scmp.lt.u32.totalorder %s1918_s7, %s2542_s8 }
 0x1c5   : > { %p1920_p2 = pnand %p1919_p13, %p2306_p3 }
 0x1c6   : > { %p1925_p10 = por %p1924_p0, %p1923_p6 }
 0x1c7   : > { %p1921_p9 = pneg %p1920_p2 }
 0x1c8   : > { %p1927_p7 = por %p1926_p5, %p1925_p10 }
 0x1ca   : > { %p1928_p11 = pnand %p1927_p7, %p1921_p9 }
 0x1cc   : > { %1931 = shalt.err (!%p1928_p11)
}
 0x1cd   : > { %s2079_s3 = smov 128   ;;  %s2080_s21 = smov 8   ;;  %v926_v25 = vadd.f32 %v1545_v30, %v2536_v27  ;;  %v881_v32 = vadd.f32 %v2536_v27, %v880_v31  ;;  %v920_v33 = vpop.f32.mrb[17].mxu1 }
 0x1ce   : > { %1681 = dma.vmem_to_hbm [thread:$0]  (%p2306_p3), %s2544_s30, 2048, %s2542_s8, %s1008_s26, %s2079_s3, %s2079_s3, %s2080_s21  }
 0x1cf   : > { %s2591_s7 = scalar_lea.sflag [#allocation12], %s1012_s12  ;;  %s1932_s24 = scalar_lea.vmem %s2554_s23, 2048 }
 0x1d0   : > { %p1933_p1 = scmp.ne.s32.totalorder %s2554_s23, %s1932_s24  ;;  %s2081_s1 = smov [#allocation11]  }
 0x1d1   : > { %s1936_s22 = sshll.u32 %s2081_s1, 4  ;;  %s1937_s22 = int_to_ptr.vmem [resolvable:$false] %s1936_s22 }
 0x1d2   : > { %p1934_p4 = pnand %p1933_p1, %p2306_p3  ;;  %s1938_s5 = scalar_lea.vmem %s1937_s22, 4096 }
 0x1d3   : > { %p1939_p12 = scmp.lt.s32.totalorder %s2554_s23, %s1937_s22  ;;  %p1940_p13 = scmp.lt.s32.totalorder %s1938_s5, %s1932_s24 }
 0x1d4   : > { %p1935_p8 = pneg %p1934_p4 }
 0x1d5   : > { %p1941_p2 = por %p1940_p13, %p1939_p12 }
 0x1d7   : > { %p1942_p9 = pnand %p1941_p2, %p1935_p8 }
 0x1d9   : > { %1945 = shalt.err (!%p1942_p9)
}
 0x1da   : > { %s1946_s17 = scalar_lea.hbm %s2552_s25, 2048  ;;  %s1950_s30 = scalar_lea.hbm %s2770_s29, 8192 }
 0x1db   : > { %p1947_p6 = scmp.ne.s32.totalorder %s2552_s25, %s1946_s17  ;;  %p1951_p5 = scmp.lt.u32.totalorder %s2552_s25, %s2770_s29 }
 0x1dc   : > { %p1952_p7 = scmp.lt.u32.totalorder %s1950_s30, %s1946_s17  ;;  %p1954_p1 = scmp.lt.u32.totalorder %s1946_s17, %s2552_s25 }
 0x1dd   : > { %p1948_p0 = pnand %p1947_p6, %p2306_p3 }
 0x1de   : > { %p1953_p11 = por %p1952_p7, %p1951_p5 }
 0x1df   : > { %p1949_p10 = pneg %p1948_p0 }
 0x1e0   : > { %p1955_p4 = por %p1954_p1, %p1953_p11 }
 0x1e2   : > { %p1956_p8 = pnand %p1955_p4, %p1949_p10 }
 0x1e4   : > { %1959 = shalt.err (!%p1956_p8)
}
 0x1e5   : > { %1682 = dma.vmem_to_hbm [thread:$0]  (%p2306_p3), %s2554_s23, 2048, %s2552_s25, %s2591_s7, %s2079_s3, %s2079_s3, %s2080_s21   ;;  %v921_v34 = vadd.f32 %v2536_v27, %v920_v33  ;;  %v1536_v35 = vpop.f32.mrb[18].mxu0  ;;  %v1548_v37 = vpop.f32.mrb[18].mxu1 }
 0x1e6   : > { %s2619_s19 = scalar_lea.vmem [#allocation13], %s2377_s28  ;;  %v896_v36 = vadd.f32 %v1536_v35, %v2536_v27  ;;  %v890_v38 = vpop.f32.mrb[19].mxu0  ;;  %v936_v39 = vadd.f32 %v1548_v37, %v2536_v27  ;;  %v930_v41 = vpop.f32.mrb[19].mxu1  ;;  %s2771_s24 = sld [smem:[#allocation29_spill]] }
 0x1e7   : > { %992 = vst [vmem:[%s2619_s19 + $0x8] sm:$0xff] %v886_v29  ;;  %1000 = vst [vmem:[%s2619_s19 + $0x48] sm:$0xff] %v926_v25  ;;  %v891_v40 = vadd.f32 %v2536_v27, %v890_v38  ;;  %v931_v42 = vadd.f32 %v2536_v27, %v930_v41  ;;  %v1539_v43 = vpop.f32.mrb[20].mxu0  ;;  %v1551_v45 = vpop.f32.mrb[20].mxu1  ;;  %s1069_s28 = sshll.u32 %s2619_s19, 4  ;;  %s2082_s5 = smov [#allocation13]   ;;  %s2654_s28 = int_to_ptr.vmem [resolvable:$true] %s1069_s28 }
 0x1e8   : > { %991 = vst [vmem:[%s2619_s19] sm:$0xff] %v881_v32  ;;  %999 = vst [vmem:[%s2619_s19 + $0x40] sm:$0xff] %v921_v34  ;;  %v906_v44 = vadd.f32 %v1539_v43, %v2536_v27  ;;  %v900_v46 = vpop.f32.mrb[21].mxu0  ;;  %v946_v47 = vadd.f32 %v1551_v45, %v2536_v27  ;;  %v940_v49 = vpop.f32.mrb[21].mxu1  ;;  %s1960_s22 = scalar_lea.vmem %s2654_s28, 2048  ;;  %s1964_s17 = sshll.u32 %s2082_s5, 4  ;;  %s1965_s17 = int_to_ptr.vmem [resolvable:$false] %s1964_s17 }
 0x1e9   : > { %994 = vst [vmem:[%s2619_s19 + $0x18] sm:$0xff] %v896_v36  ;;  %1002 = vst [vmem:[%s2619_s19 + $0x58] sm:$0xff] %v936_v39  ;;  %v901_v48 = vadd.f32 %v2536_v27, %v900_v46  ;;  %v941_v50 = vadd.f32 %v2536_v27, %v940_v49  ;;  %v1542_v51 = vpop.f32.mrb[22].mxu0  ;;  %v1554_v53 = vpop.f32.mrb[22].mxu1  ;;  %p1961_p12 = scmp.ne.s32.totalorder %s2654_s28, %s1960_s22  ;;  %s1966_s20 = scalar_lea.vmem %s1965_s17, 4096 }
 0x1ea   : > { %993 = vst [vmem:[%s2619_s19 + $0x10] sm:$0xff] %v891_v40  ;;  %1001 = vst [vmem:[%s2619_s19 + $0x50] sm:$0xff] %v931_v42  ;;  %v916_v52 = vadd.f32 %v1542_v51, %v2536_v27  ;;  %v910_v54 = vpop.f32.mrb[23].mxu0  ;;  %v956_v55 = vadd.f32 %v1554_v53, %v2536_v27  ;;  %v950_v57 = vpop.f32.mrb[23].mxu1  ;;  %p1967_p9 = scmp.lt.s32.totalorder %s2654_s28, %s1965_s17  ;;  %p1968_p6 = scmp.lt.s32.totalorder %s1966_s20, %s1960_s22 }
 0x1eb   : > { %996 = vst [vmem:[%s2619_s19 + $0x28] sm:$0xff] %v906_v44  ;;  %1004 = vst [vmem:[%s2619_s19 + $0x68] sm:$0xff] %v946_v47  ;;  %v911_v56 = vadd.f32 %v2536_v27, %v910_v54  ;;  %v951_v58 = vadd.f32 %v2536_v27, %v950_v57  ;;  %p1962_p13 = pnand %p1961_p12, %p2306_p3 }
 0x1ec   : > { %995 = vst [vmem:[%s2619_s19 + $0x20] sm:$0xff] %v901_v48  ;;  %1003 = vst [vmem:[%s2619_s19 + $0x60] sm:$0xff] %v941_v50  ;;  %s2652_s1 = scalar_lea.hbm %s2771_s24, %s2521_s27  ;;  %p1969_p0 = por %p1968_p6, %p1967_p9 }
 0x1ed   : > { %998 = vst [vmem:[%s2619_s19 + $0x38] sm:$0xff] %v916_v52  ;;  %1006 = vst [vmem:[%s2619_s19 + $0x78] sm:$0xff] %v956_v55  ;;  %p1963_p2 = pneg %p1962_p13 }
 0x1ee   : > { %997 = vst [vmem:[%s2619_s19 + $0x30] sm:$0xff] %v911_v56  ;;  %1005 = vst [vmem:[%s2619_s19 + $0x70] sm:$0xff] %v951_v58 }
 0x1ef   : > { %p1970_p10 = pnand %p1969_p0, %p1963_p2 }
 0x1f1   : > { %1973 = shalt.err (!%p1970_p10)
}
 0x1f2   : > { %s1974_s27 = scalar_lea.hbm %s2652_s1, 2048  ;;  %s1978_s8 = scalar_lea.hbm %s2771_s24, 8192 }
 0x1f3   : > { %p1975_p5 = scmp.ne.s32.totalorder %s2652_s1, %s1974_s27  ;;  %p1979_p1 = scmp.lt.u32.totalorder %s2652_s1, %s2771_s24 }
 0x1f4   : > { %p1980_p4 = scmp.lt.u32.totalorder %s1978_s8, %s1974_s27  ;;  %p1982_p12 = scmp.lt.u32.totalorder %s1974_s27, %s2652_s1 }
 0x1f5   : > { %p1976_p7 = pnand %p1975_p5, %p2306_p3 }
 0x1f6   : > { %p1981_p8 = por %p1980_p4, %p1979_p1 }
 0x1f7   : > { %p1977_p11 = pneg %p1976_p7 }
 0x1f8   : > { %p1983_p13 = por %p1982_p12, %p1981_p8 }
 0x1fa   : > { %p1984_p2 = pnand %p1983_p13, %p1977_p11 }
 0x1fc   : > { %1987 = shalt.err (!%p1984_p2)
}
 0x1fd   : > { %1683 = dma.vmem_to_hbm [thread:$0]  (%p2306_p3), %s2654_s28, 2048, %s2652_s1, %s2591_s7, %s2079_s3, %s2079_s3, %s2080_s21  }
 0x1fe PF: > { %s2772_s23 = sld [smem:[#allocation19_spill]]  ;;  %s2773_s25 = sld [smem:[#allocation21_spill]] }
 0x1ff   : > { %p1718_p9 = scmp.ge.s32.totalorder %s2070_s16, 2 }
 0x204   : > { %s1084_s22 = sand.u32 1, %s2772_s23   ;;  %p2774_p6 = scmp.ne.s32.totalorder %s2773_s25, 0 }
 0x205   : > { %s1085_s5 = scalar_lea.sflag [#allocation4], %s1084_s22 }
 0x206   : > { %p1702_p0 = pnand %p1718_p9, %p2774_p6 }
 0x208   : > { %2033 = dma.done.wait (!%p1702_p0), %s1085_s5, 2048  }
 0x209   : > { %2035 = vsyncadd (!%p1702_p0), %s1085_s5, 4294965248  ;;  %s2775_s13 = sadd.s32 4294967294, %s2070_s16  }
 0x20a   : > { %s1093_s17 = sand.u32 1, %s2775_s13  }
 0x20b   : > { %s1094_s20 = scalar_lea.sflag [#allocation12], %s1093_s17 }
 0x20c   : > { %2037 = dma.done.wait (!%p1702_p0), %s1094_s20, 4096  }
 0x20d   : > { %2039 = vsyncadd (!%p1702_p0), %s1094_s20, 4294963200  ;;  %s31_s16 = sadd.s32 1, %s2070_s16   ;;  %s2776_s3 = sld [smem:[#allocation22_spill]] }
 0x20e   : > { %p28_p3 = scmp.ge.s32.totalorder %s31_s16, 6   ;;  %s2777_s30 = smov %s2046_s10 }
 0x20f   : > { %s2778_s10 = smov %s2050_s11  ;;  %s2779_s11 = smov %s2323_s18 }
 0x210   : > { %s2780_s12 = smov %s2062_s14  ;;  %s2781_s13 = smov %s2066_s15 }
 0x211   : > { %s2782_s14 = smov %s2785_s9  ;;  %30 = sbr.rel (!%p28_p3) target bundleno = 19 (0x13), region = 137 }
 0x213   : > { %s2783_s15 = smov %s2776_s3 }
 0x218   :  { %1108 = vsyncpa [#allocation3], 1 }
 0x219   :  { %1110 = vsyncpa [#allocation3 + $0x1], 1 }
 0x21a   :  { %1111 = vsyncpa [#allocation6], 1 }
 0x21b   :  { %1112 = vsyncpa [#allocation9], 1 }
 0x21c   :  { %1113 = vsyncpa [#allocation4], 1 }
 0x21d   :  { %1115 = vsyncpa [#allocation4 + $0x1], 1 }
 0x21e   :  { %1116 = vsyncpa [#allocation12], 1 }
 0x21f   :  { %1118 = vsyncpa [#allocation12 + $0x1], 1 }

</bundles_post_ra>
